<compile_context>
chip_gen: v7x
topology: tpu7x:2x2x1
jax: 0.10.0
libtpu: 0.0.40
codegen_flags: <defaults>
</compile_context>

<pallas_src>
import functools

import jax
import jax.numpy as jnp
import numpy as np
from jax.experimental import pallas as pl
from jax.experimental.pallas import tpu as pltpu

LANE = 128


def _round_up(x, m):
    return (x + m - 1) // m * m


def _vmem_capacity_bytes():
    """Physical VMEM of the local chip; conservative fallback (v7x = 64 MiB)."""
    try:
        info = pltpu.get_tpu_info()
        cap = getattr(info, "vmem_capacity_bytes", None)
        if cap:
            return int(cap)
    except Exception:
        pass
    return 64 * 1024 * 1024


def _vmem_estimate(tm, tk, c_in, c_out):
    """Rough per-step VMEM footprint (double-buffered inputs/outputs + scratch)."""
    a = 2 * tm * tk * 2                 # A blocks (bf16)
    xs = 2 * tk * c_in * 2              # source-row features (bf16)
    xd = 2 * tm * c_in * 2              # self-row features (bf16)
    w = 2 * 2 * c_in * c_out * 2        # W_l, W_r (bf16, resident)
    bias = 2 * c_out * 4
    dinv = 2 * tm * 4
    out = 2 * tm * c_out * 4
    acc = tm * c_in * 4                 # f32 accumulator scratch
    return a + xs + xd + w + bias + dinv + out + acc


def _pick_tiles(n, c_in_pad, c_out_pad, budget):
    """Pad N only to 128; pick TK<=512 and the largest VMEM-fitting TM<=2048
    (preferring >=2 dst tiles for megacore balance)."""
    n_pad = _round_up(max(n, 1), LANE)
    divs = [t for t in range(LANE, n_pad + 1, LANE) if n_pad % t == 0]
    tk = max(t for t in divs if t <= 512)
    cands = [t for t in divs
             if t <= 2048 and _vmem_estimate(t, tk, c_in_pad, c_out_pad) <= budget]
    if not cands:
        cands = [LANE]
    tm = max(cands)
    two = [t for t in cands if n_pad // t >= 2]
    if two:
        tm = max(two)
    return tm, tk, n_pad


# ----------------------------------------------------------------------------- kernels

def _sage_layer_kernel(kidx_ref, cnt_ref, a_ref, xs_ref, xd_ref, wl_ref, wr_ref,
                       b_ref, dinv_ref, o_ref, acc_ref, *, apply_relu):
    """Grid (i, j): i = destination-node tile, j = position in that tile's
    compacted list of nonzero source tiles (reduction axis)."""
    i = pl.program_id(0)
    j = pl.program_id(1)

    @pl.when(j == 0)
    def _init():
        acc_ref[...] = jnp.zeros_like(acc_ref)

    # Only accumulate source-tile blocks that actually contain edges.
    @pl.when(j < cnt_ref[i])
    def _accumulate():
        acc_ref[...] += jnp.dot(a_ref[...], xs_ref[...],
                                preferred_element_type=jnp.float32)

    @pl.when(j == pl.num_programs(1) - 1)
    def _finalize():
        # f32 mean normalization (1/deg) in the epilogue, then bf16 for the MXU.
        agg = (acc_ref[...] * dinv_ref[...]).astype(jnp.bfloat16)
        out = jnp.dot(agg, wl_ref[...], preferred_element_type=jnp.float32)
        out = out + jnp.dot(xd_ref[...], wr_ref[...],
                            preferred_element_type=jnp.float32)
        out = out + b_ref[...]                      # f32 bias
        if apply_relu:
            out = jnp.maximum(out, 0.0)             # f32 ReLU
        o_ref[...] = out.astype(o_ref.dtype)


def _pool_kernel(p_ref, x_ref, o_ref, acc_ref):
    """global_add_pool: pooled = P @ X (f32), reduction over node tiles."""
    k = pl.program_id(0)

    @pl.when(k == 0)
    def _init():
        acc_ref[...] = jnp.zeros_like(acc_ref)

    acc_ref[...] += jnp.dot(p_ref[...], x_ref[...],
                            preferred_element_type=jnp.float32)

    @pl.when(k == pl.num_programs(0) - 1)
    def _finalize():
        o_ref[...] = acc_ref[...].astype(o_ref.dtype)


# ----------------------------------------------------------------------------- wrappers

def sage_layer(a, x, deg_inv, w_l, w_r, b, kidx, counts, *, tm, tk,
               apply_relu, out_dtype, vmem_limit):
    n_pad = a.shape[0]
    c_in_pad = x.shape[1]
    c_out_pad = w_l.shape[1]
    grid = (n_pad // tm, n_pad // tk)
    kern = functools.partial(_sage_layer_kernel, apply_relu=apply_relu)
    # NOTE: if a profile shows exposed DMA between j-steps, pipeline_mode=
    # pl.Buffered(3) on the A BlockSpec is the next knob to try.
    return pl.pallas_call(
        kern,
        out_shape=jax.ShapeDtypeStruct((n_pad, c_out_pad), out_dtype),
        grid_spec=pltpu.PrefetchScalarGridSpec(
            num_scalar_prefetch=2,
            grid=grid,
            in_specs=[
                # A block: data-dependent source-tile index (block-sparse skip;
                # padded tail repeats the previous index -> no DMA issued).
                pl.BlockSpec((tm, tk), lambda i, j, kidx, cnt: (i, kidx[i, j])),
                pl.BlockSpec((tk, c_in_pad), lambda i, j, kidx, cnt: (kidx[i, j], 0)),
                pl.BlockSpec((tm, c_in_pad), lambda i, j, kidx, cnt: (i, 0)),
                pl.BlockSpec((c_in_pad, c_out_pad), lambda i, j, kidx, cnt: (0, 0)),
                pl.BlockSpec((c_in_pad, c_out_pad), lambda i, j, kidx, cnt: (0, 0)),
                pl.BlockSpec((1, c_out_pad), lambda i, j, kidx, cnt: (0, 0)),
                pl.BlockSpec((tm, 1), lambda i, j, kidx, cnt: (i, 0)),
            ],
            out_specs=pl.BlockSpec((tm, c_out_pad), lambda i, j, kidx, cnt: (i, 0)),
            scratch_shapes=[pltpu.VMEM((tm, c_in_pad), jnp.float32)],
        ),
        compiler_params=pltpu.CompilerParams(
            dimension_semantics=("parallel", "arbitrary"),
            vmem_limit_bytes=vmem_limit,
        ),
    )(kidx, counts, a, x, x, w_l, w_r, b, deg_inv)


def global_add_pool(x, pool_mat, *, tk, vmem_limit):
    g_pad, n_pad = pool_mat.shape
    c_pad = x.shape[1]
    grid = (n_pad // tk,)
    return pl.pallas_call(
        _pool_kernel,
        out_shape=jax.ShapeDtypeStruct((g_pad, c_pad), jnp.float32),
        grid_spec=pltpu.PrefetchScalarGridSpec(
            num_scalar_prefetch=0,
            grid=grid,
            in_specs=[
                pl.BlockSpec((g_pad, tk), lambda k: (0, k)),
                pl.BlockSpec((tk, c_pad), lambda k: (k, 0)),
            ],
            out_specs=pl.BlockSpec((g_pad, c_pad), lambda k: (0, 0)),
            scratch_shapes=[pltpu.VMEM((g_pad, c_pad), jnp.float32)],
        ),
        compiler_params=pltpu.CompilerParams(
            dimension_semantics=("arbitrary",),
            vmem_limit_bytes=vmem_limit,
        ),
    )(pool_mat, x)


# ----------------------------------------------------------------------------- model glue

def _pad2(arr, rows, cols):
    out = jnp.zeros((rows, cols), arr.dtype)
    return out.at[:arr.shape[0], :arr.shape[1]].set(arr)


def build_graph_operands(edge_index, num_nodes, n_pad, tm, tk):
    """Binary (0/1) padded bf16 adjacency (exact), f32 1/deg for the epilogue,
    and compacted per-dst-tile lists of nonzero source-tile indices.
    edge_index: [2, E] int32, row 0 = source j, row 1 = target i (PyG convention).
    NOTE: duplicate edges collapse (like the original implementation's comment)."""
    src = edge_index[0].astype(jnp.int32)
    dst = edge_index[1].astype(jnp.int32)
    # Single scatter straight into the padded bf16 buffer (no f32 N^2 temporaries).
    a = jnp.zeros((n_pad, n_pad), jnp.bfloat16).at[dst, src].set(jnp.bfloat16(1.0))
    deg = jnp.sum(a, axis=1, dtype=jnp.float32)
    deg_inv = (1.0 / jnp.maximum(deg, 1.0)).reshape(n_pad, 1).astype(jnp.float32)

    n_i, n_k = n_pad // tm, n_pad // tk
    mask = jnp.zeros((n_i, n_k), jnp.int32).at[dst // tm, src // tk].set(1)
    counts = jnp.sum(mask, axis=1).astype(jnp.int32)                 # (n_i,)
    order = jnp.argsort(-mask, axis=1).astype(jnp.int32)             # nonzero k first
    jr = jnp.arange(n_k, dtype=jnp.int32)[None, :]
    last = jnp.take_along_axis(order, jnp.maximum(counts - 1, 0)[:, None], axis=1)
    kidx = jnp.where(jr < counts[:, None], order, last).astype(jnp.int32)
    return a, deg_inv, kidx, counts


def init_params(key, in_channels, hidden_channels, out_channels, n_layers):
    """Glorot-uniform init at logical shapes, zero-padded to 128-lane-dense blocks.
    Weights pre-transposed to [C_in, C_out]; padded columns are zero."""
    dims = []
    if n_layers > 1:
        dims.append((in_channels, hidden_channels))
        for _ in range(1, n_layers - 1):
            dims.append((hidden_channels, hidden_channels))
        dims.append((hidden_channels, out_channels))
    else:
        dims.append((in_channels, out_channels))

    def glorot(k, shape):
        lim = (6.0 / (shape[0] + shape[1])) ** 0.5
        return jax.random.uniform(k, shape, jnp.float32, -lim, lim)

    convs = []
    for (cin, cout) in dims:
        key, k1, k2 = jax.random.split(key, 3)
        cin_p = _round_up(max(cin, LANE), LANE)
        cout_p = _round_up(max(cout, LANE), LANE)
        convs.append(dict(
            w_l=_pad2(glorot(k1, (cin, cout)), cin_p, cout_p).astype(jnp.bfloat16),
            w_r=_pad2(glorot(k2, (cin, cout)), cin_p, cout_p).astype(jnp.bfloat16),
            b=jnp.zeros((1, cout_p), jnp.float32),
            c_in=cin, c_out=cout,
        ))
    # fc1/fc2 (projection head) are unused by forward(); not materialized here.
    return convs


def graphsage_forward(convs, x, edge_index, batch=None, num_graphs=None):
    """Mirrors GraphSAGE.forward(x, edge_index, batch=batch): SAGEConv (mean aggr,
    root_weight, bias) per layer, ReLU + dropout(identity) between layers,
    optional global_add_pool."""
    n, c_in = x.shape
    c_pads = ([_round_up(max(p["c_in"], LANE), LANE) for p in convs]
              + [_round_up(max(p["c_out"], LANE), LANE) for p in convs])
    c_max = max(c_pads)

    budget = (_vmem_capacity_bytes() * 3) // 4
    tm, tk, n_pad = _pick_tiles(n, c_max, c_max, budget)

    a, deg_inv, kidx, counts = build_graph_operands(edge_index, n, n_pad, tm, tk)

    c_in_pad = _round_up(max(c_in, LANE), LANE)
    h = jnp.zeros((n_pad, c_in_pad), jnp.bfloat16).at[:n, :c_in].set(
        x.astype(jnp.bfloat16))

    n_layers = len(convs)
    for i, p in enumerate(convs):
        last = (i == n_layers - 1)
        h = sage_layer(a, h, deg_inv, p["w_l"], p["w_r"], p["b"], kidx, counts,
                       tm=tm, tk=tk, apply_relu=not last,
                       out_dtype=jnp.float32 if last else jnp.bfloat16,
                       vmem_limit=budget)

    c_out = convs[-1]["c_out"]
    if batch is None:
        return h[:n, :c_out]

    g = int(num_graphs)
    g_pad = max(8, _round_up(g, 8))
    batch_pad = jnp.full((n_pad,), g_pad, jnp.int32).at[:n].set(batch.astype(jnp.int32))
    pool_mat = (batch_pad[None, :] ==
                jnp.arange(g_pad, dtype=jnp.int32)[:, None]).astype(jnp.float32)
    # TODO(synk): fuse sum-pooling into the last layer's finalize epilogue.
    pooled = global_add_pool(h, pool_mat, tk=tk, vmem_limit=budget)
    return pooled[:g, :c_out]


# ----------------------------------------------------------------------------- reference

def reference_forward(convs, x, edge_index, batch=None, num_graphs=None):
    """Pure-JAX f32 reference with identical parameters (for tolerance check)."""
    n = x.shape[0]
    src, dst = edge_index[0], edge_index[1]
    adj = jnp.zeros((n, n), jnp.float32).at[dst, src].set(1.0)
    deg = jnp.sum(adj, axis=1, keepdims=True)
    a = adj / jnp.maximum(deg, 1.0)
    h = x.astype(jnp.float32)
    for i, p in enumerate(convs):
        cin, cout = p["c_in"], p["c_out"]
        w_l = p["w_l"][:cin, :cout].astype(jnp.float32)
        w_r = p["w_r"][:cin, :cout].astype(jnp.float32)
        b = p["b"][:, :cout]
        h = a @ h @ w_l + h @ w_r + b
        if i < len(convs) - 1:
            h = jnp.maximum(h, 0.0)
    if batch is not None:
        seg = jax.nn.one_hot(batch, num_graphs, dtype=jnp.float32)  # [N, G]
        h = seg.T @ h
    return h


# ----------------------------------------------------------------------------- main

if __name__ == "__main__":
    key = jax.random.PRNGKey(0)

    # small synthetic graph: 32 nodes, 96 directed edges, 2 graphs in the batch
    N, E = 32, 96
    IN_CHANNELS, HIDDEN, OUT_CHANNELS = 16, 32, 16
    N_LAYERS = 2
    NUM_GRAPHS = 2

    key, kx, ke, kp = jax.random.split(key, 4)
    x = jax.random.normal(kx, (N, IN_CHANNELS), dtype=jnp.float32)
    edge_index = jax.random.randint(ke, (2, E), 0, N, dtype=jnp.int32)
    batch = jnp.concatenate([
        jnp.zeros((N // 2,), jnp.int32),
        jnp.ones((N - N // 2,), jnp.int32),
    ])

    convs = init_params(kp, IN_CHANNELS, HIDDEN, OUT_CHANNELS, N_LAYERS)

    # node-level output (batch=None path of forward)
    node_out = jax.block_until_ready(graphsage_forward(convs, x, edge_index))
    assert node_out.shape == (N, OUT_CHANNELS)

    # graph-level output (batch provided -> sum pooling)
    graph_out = jax.block_until_ready(
        graphsage_forward(convs, x, edge_index, batch=batch, num_graphs=NUM_GRAPHS))
    assert graph_out.shape == (NUM_GRAPHS, OUT_CHANNELS)

    # tolerance check vs f32 pure-JAX reference (kernel uses bf16 MXU inputs,
    # binary A + f32 1/deg epilogue -> tighter than the previous version)
    node_ref = reference_forward(convs, x, edge_index)
    graph_ref = reference_forward(convs, x, edge_index, batch=batch,
                                  num_graphs=NUM_GRAPHS)
    np.testing.assert_allclose(np.asarray(node_out), np.asarray(node_ref),
                               rtol=5e-2, atol=5e-2)
    np.testing.assert_allclose(np.asarray(graph_out), np.asarray(graph_ref),
                               rtol=5e-2, atol=2e-1)

    print("KERNEL_OK")
</pallas_src>

<mosaic_0001>
module attributes {stable_mosaic.version = 11 : i64} {
  func.func @_sage_layer_kernel(%arg0: i32, %arg1: i32, %arg2: memref<1x1xi32, #tpu.memory_space<smem>>, %arg3: memref<1xi32, #tpu.memory_space<smem>>, %arg4: memref<128x128xbf16, #tpu.memory_space<vmem>>, %arg5: memref<128x128xbf16, #tpu.memory_space<vmem>>, %arg6: memref<128x128xbf16, #tpu.memory_space<vmem>>, %arg7: memref<128x128xbf16, #tpu.memory_space<vmem>>, %arg8: memref<128x128xbf16, #tpu.memory_space<vmem>>, %arg9: memref<1x128xf32, #tpu.memory_space<vmem>>, %arg10: memref<128x1xf32, #tpu.memory_space<vmem>>, %arg11: memref<128x128xbf16, #tpu.memory_space<vmem>>, %arg12: memref<128x128xf32, #tpu.memory_space<vmem>>) attributes {dimension_semantics = [#tpu.dimension_semantics<parallel>, #tpu.dimension_semantics<arbitrary>], iteration_bounds = array<i64: 1, 1>, scalar_prefetch = 2 : i64, scratch_operands = 1 : i64, tpu.core_type = #tpu.core_type<tc>, window_params = [{transform_indices = @transform_0, window_bounds = array<i64: 128, 128>}, {transform_indices = @transform_1, window_bounds = array<i64: 128, 128>}, {transform_indices = @transform_2, window_bounds = array<i64: 128, 128>}, {pipeline_mode = #tpu.pipeline_mode<synchronous>, transform_indices = @transform_3, window_bounds = array<i64: 128, 128>}, {pipeline_mode = #tpu.pipeline_mode<synchronous>, transform_indices = @transform_4, window_bounds = array<i64: 128, 128>}, {pipeline_mode = #tpu.pipeline_mode<synchronous>, transform_indices = @transform_5, window_bounds = array<i64: 1, 128>}, {transform_indices = @transform_6, window_bounds = array<i64: 128, 1>}, {transform_indices = @transform_7, window_bounds = array<i64: 128, 128>}]} {
    %c0_i32 = arith.constant 0 : i32
    %0 = arith.cmpi eq, %arg1, %c0_i32 : i32
    %1 = arith.extui %0 : i1 to i32
    %c0_i32_0 = arith.constant 0 : i32
    %2 = arith.cmpi ne, %1, %c0_i32_0 : i32
    scf.if %2 {
      %cst = arith.constant 0.000000e+00 : f32
      %11 = vector.broadcast %cst : f32 to vector<128x128xf32>
      %c0 = arith.constant 0 : index
      %c0_4 = arith.constant 0 : index
      %12 = vector.load %arg12[%c0, %c0_4] : memref<128x128xf32, #tpu.memory_space<vmem>>, vector<128x128xf32>
      tpu.vector_store %arg12[%c0, %c0_4], %11 {strides = array<i32>} : memref<128x128xf32, #tpu.memory_space<vmem>>, vector<128x128xf32>,
    } else {
    }
    %3 = arith.index_cast %arg0 : i32 to index
    %4 = memref.load %arg3[%3] : memref<1xi32, #tpu.memory_space<smem>>
    %5 = arith.cmpi slt, %arg1, %4 : i32
    %6 = arith.extui %5 : i1 to i32
    %c0_i32_1 = arith.constant 0 : i32
    %7 = arith.cmpi ne, %6, %c0_i32_1 : i32
    scf.if %7 {
      %c0 = arith.constant 0 : index
      %c0_4 = arith.constant 0 : index
      %11 = vector.load %arg12[%c0, %c0_4] : memref<128x128xf32, #tpu.memory_space<vmem>>, vector<128x128xf32>
      %c0_5 = arith.constant 0 : index
      %c0_6 = arith.constant 0 : index
      %12 = vector.load %arg4[%c0_5, %c0_6] : memref<128x128xbf16, #tpu.memory_space<vmem>>, vector<128x128xbf16>
      %c0_7 = arith.constant 0 : index
      %c0_8 = arith.constant 0 : index
      %13 = vector.load %arg5[%c0_7, %c0_8] : memref<128x128xbf16, #tpu.memory_space<vmem>>, vector<128x128xbf16>
      %cst = arith.constant dense<0.000000e+00> : vector<128x128xf32>
      %14 = tpu.matmul %12, %13, %cst {dimension_numbers = #tpu.dot_dimension_numbers<[1], [0], [0], [1], [0, 0, 1, 1], [], []>} : vector<128x128xbf16>, vector<128x128xbf16>, vector<128x128xf32> -> vector<128x128xf32>
      %15 = arith.addf %11, %14 : vector<128x128xf32>
      %c0_9 = arith.constant 0 : index
      %c0_10 = arith.constant 0 : index
      %16 = vector.load %arg12[%c0_9, %c0_10] : memref<128x128xf32, #tpu.memory_space<vmem>>, vector<128x128xf32>
      tpu.vector_store %arg12[%c0_9, %c0_10], %15 {strides = array<i32>} : memref<128x128xf32, #tpu.memory_space<vmem>>, vector<128x128xf32>,
    } else {
    }
    %c0_i32_2 = arith.constant 0 : i32
    %8 = arith.cmpi eq, %arg1, %c0_i32_2 : i32
    %9 = arith.extui %8 : i1 to i32
    %c0_i32_3 = arith.constant 0 : i32
    %10 = arith.cmpi ne, %9, %c0_i32_3 : i32
    scf.if %10 {
      %c0 = arith.constant 0 : index
      %c0_4 = arith.constant 0 : index
      %11 = vector.load %arg12[%c0, %c0_4] : memref<128x128xf32, #tpu.memory_space<vmem>>, vector<128x128xf32>
      %c0_5 = arith.constant 0 : index
      %c0_6 = arith.constant 0 : index
      %12 = vector.load %arg10[%c0_5, %c0_6] : memref<128x1xf32, #tpu.memory_space<vmem>>, vector<128x1xf32>
      %13 = vector.broadcast %12 : vector<128x1xf32> to vector<128x128xf32>
      %14 = arith.mulf %11, %13 : vector<128x128xf32>
      %15 = arith.truncf %14 : vector<128x128xf32> to vector<128x128xbf16>
      %c0_7 = arith.constant 0 : index
      %c0_8 = arith.constant 0 : index
      %16 = vector.load %arg7[%c0_7, %c0_8] : memref<128x128xbf16, #tpu.memory_space<vmem>>, vector<128x128xbf16>
      %cst = arith.constant dense<0.000000e+00> : vector<128x128xf32>
      %17 = tpu.matmul %15, %16, %cst {dimension_numbers = #tpu.dot_dimension_numbers<[1], [0], [0], [1], [0, 0, 1, 1], [], []>} : vector<128x128xbf16>, vector<128x128xbf16>, vector<128x128xf32> -> vector<128x128xf32>
      %c0_9 = arith.constant 0 : index
      %c0_10 = arith.constant 0 : index
      %18 = vector.load %arg6[%c0_9, %c0_10] : memref<128x128xbf16, #tpu.memory_space<vmem>>, vector<128x128xbf16>
      %c0_11 = arith.constant 0 : index
      %c0_12 = arith.constant 0 : index
      %19 = vector.load %arg8[%c0_11, %c0_12] : memref<128x128xbf16, #tpu.memory_space<vmem>>, vector<128x128xbf16>
      %cst_13 = arith.constant dense<0.000000e+00> : vector<128x128xf32>
      %20 = tpu.matmul %18, %19, %cst_13 {dimension_numbers = #tpu.dot_dimension_numbers<[1], [0], [0], [1], [0, 0, 1, 1], [], []>} : vector<128x128xbf16>, vector<128x128xbf16>, vector<128x128xf32> -> vector<128x128xf32>
      %21 = arith.addf %17, %20 : vector<128x128xf32>
      %c0_14 = arith.constant 0 : index
      %c0_15 = arith.constant 0 : index
      %22 = vector.load %arg9[%c0_14, %c0_15] : memref<1x128xf32, #tpu.memory_space<vmem>>, vector<1x128xf32>
      %23 = vector.broadcast %22 : vector<1x128xf32> to vector<128x128xf32>
      %24 = arith.addf %21, %23 : vector<128x128xf32>
      %cst_16 = arith.constant 0.000000e+00 : f32
      %25 = vector.broadcast %cst_16 : f32 to vector<128x128xf32>
      %26 = arith.maximumf %24, %25 : vector<128x128xf32>
      %27 = arith.truncf %26 : vector<128x128xf32> to vector<128x128xbf16>
      %c0_17 = arith.constant 0 : index
      %c0_18 = arith.constant 0 : index
      %28 = vector.load %arg11[%c0_17, %c0_18] : memref<128x128xbf16, #tpu.memory_space<vmem>>, vector<128x128xbf16>
      tpu.vector_store %arg11[%c0_17, %c0_18], %27 {strides = array<i32>} : memref<128x128xbf16, #tpu.memory_space<vmem>>, vector<128x128xbf16>,
    } else {
    }
    return
  }
  func.func @transform_0(%arg0: i32, %arg1: i32, %arg2: memref<1x1xi32, #tpu.memory_space<smem>>, %arg3: memref<1xi32, #tpu.memory_space<smem>>) -> (i32, i32) {
    %0 = arith.index_cast %arg0 : i32 to index
    %1 = arith.index_cast %arg1 : i32 to index
    %2 = memref.load %arg2[%0, %1] : memref<1x1xi32, #tpu.memory_space<smem>>
    %c0_i32 = arith.constant 0 : i32
    return %arg0, %2 : i32, i32
  }
  func.func @transform_1(%arg0: i32, %arg1: i32, %arg2: memref<1x1xi32, #tpu.memory_space<smem>>, %arg3: memref<1xi32, #tpu.memory_space<smem>>) -> (i32, i32) {
    %0 = arith.index_cast %arg0 : i32 to index
    %1 = arith.index_cast %arg1 : i32 to index
    %2 = memref.load %arg2[%0, %1] : memref<1x1xi32, #tpu.memory_space<smem>>
    %c0_i32 = arith.constant 0 : i32
    %c0_i32_0 = arith.constant 0 : i32
    return %2, %c0_i32 : i32, i32
  }
  func.func @transform_2(%arg0: i32, %arg1: i32, %arg2: memref<1x1xi32, #tpu.memory_space<smem>>, %arg3: memref<1xi32, #tpu.memory_space<smem>>) -> (i32, i32) {
    %c0_i32 = arith.constant 0 : i32
    %c0_i32_0 = arith.constant 0 : i32
    return %arg0, %c0_i32 : i32, i32
  }
  func.func @transform_3(%arg0: i32, %arg1: i32, %arg2: memref<1x1xi32, #tpu.memory_space<smem>>, %arg3: memref<1xi32, #tpu.memory_space<smem>>) -> (i32, i32) {
    %c0_i32 = arith.constant 0 : i32
    %c0_i32_0 = arith.constant 0 : i32
    %c0_i32_1 = arith.constant 0 : i32
    return %c0_i32, %c0_i32_0 : i32, i32
  }
  func.func @transform_4(%arg0: i32, %arg1: i32, %arg2: memref<1x1xi32, #tpu.memory_space<smem>>, %arg3: memref<1xi32, #tpu.memory_space<smem>>) -> (i32, i32) {
    %c0_i32 = arith.constant 0 : i32
    %c0_i32_0 = arith.constant 0 : i32
    %c0_i32_1 = arith.constant 0 : i32
    return %c0_i32, %c0_i32_0 : i32, i32
  }
  func.func @transform_5(%arg0: i32, %arg1: i32, %arg2: memref<1x1xi32, #tpu.memory_space<smem>>, %arg3: memref<1xi32, #tpu.memory_space<smem>>) -> (i32, i32) {
    %c0_i32 = arith.constant 0 : i32
    %c0_i32_0 = arith.constant 0 : i32
    %c0_i32_1 = arith.constant 0 : i32
    return %c0_i32, %c0_i32_0 : i32, i32
  }
  func.func @transform_6(%arg0: i32, %arg1: i32, %arg2: memref<1x1xi32, #tpu.memory_space<smem>>, %arg3: memref<1xi32, #tpu.memory_space<smem>>) -> (i32, i32) {
    %c0_i32 = arith.constant 0 : i32
    %c0_i32_0 = arith.constant 0 : i32
    return %arg0, %c0_i32 : i32, i32
  }
  func.func @transform_7(%arg0: i32, %arg1: i32, %arg2: memref<1x1xi32, #tpu.memory_space<smem>>, %arg3: memref<1xi32, #tpu.memory_space<smem>>) -> (i32, i32) {
    %c0_i32 = arith.constant 0 : i32
    %c0_i32_0 = arith.constant 0 : i32
    return %arg0, %c0_i32 : i32, i32
  }
}

</mosaic_0001>

<bundles_post_ra>
// kernel: tpu_custom_call.1
= control target key start
LH: loop header
LB: loop body
LE: loop exit
PB: predicated region body
PF: predicated region fallthrough
CT: control target
= control target key end

     0   :  { %16 = vsyncpa [#allocation7], 0  ;;  %s1813_s0 = inlined_call_operand.<no memory space> [shape: s32[1,1], index: 0, kind: input, shape index: {}]   ;;  %s1814_s1 = inlined_call_operand.<no memory space> [shape: s32[1], index: 1, kind: input, shape index: {}]   ;;  %s1815_s2 = inlined_call_operand.vmem [shape: bf16[128,128], index: 2, kind: input, shape index: {}]   ;;  %s1816_s3 = inlined_call_operand.vmem [shape: bf16[128,128], index: 3, kind: input, shape index: {}]   ;;  %s1817_s4 = inlined_call_operand.hbm [shape: bf16[128,128], index: 4, kind: input, shape index: {}]   ;;  %s1818_s5 = inlined_call_operand.hbm [shape: bf16[128,128], index: 5, kind: input, shape index: {}]   ;;  %s1819_s6 = inlined_call_operand.hbm [shape: bf16[128,128], index: 6, kind: input, shape index: {}]   ;;  %s1820_s7 = inlined_call_operand.vmem [shape: f32[1,128], index: 7, kind: input, shape index: {}]   ;;  %s1821_s8 = inlined_call_operand.vmem [shape: f32[128,1], index: 8, kind: input, shape index: {}]   ;;  %s1822_s9 = inlined_call_operand.hbm [shape: bf16[128,128], index: 9, kind: output, shape index: {}]  }
   0x1   :  { %17 = vsyncpa [#allocation10], 0 }
   0x2   :  { %18 = vsyncpa [#allocation8], 0  ;;  %s1559_s30 = smov [#allocation9]   ;;  %s1560_s11 = smov [#allocation6]  }
   0x3   :  { %s66_s10 = sshll.u32 %s1559_s30, 4  ;;  %s54_s12 = sshll.u32 %s1560_s11, 4  ;;  %s67_s10 = int_to_ptr.vmem [resolvable:$true] %s66_s10  ;;  %s1617_s12 = int_to_ptr.vmem [resolvable:$true] %s54_s12 }
   0x4   :  { %s1465_s15 = scalar_lea.hbm %s1818_s5, 1024 }
   0x5   :  { %p1466_p0 = scmp.ne.s32.totalorder %s1818_s5, %s1465_s15  ;;  %p1469_p1 = scmp.lt.u32.totalorder %s1465_s15, %s1818_s5 }
   0x7   :  { %p1471_p2 = pnand %p1469_p1, %p1466_p0 }
   0x9   :  { %1474 = shalt.err (!%p1471_p2)
}
   0xa   :  { %s1475_s20 = scalar_lea.vmem %s67_s10, 1024  ;;  %p1480_p4 = scmp.lt.s32.totalorder %s67_s10, %s67_s10 }
   0xb   :  { %p1476_p3 = scmp.ne.s32.totalorder %s67_s10, %s1475_s20  ;;  %p1481_p5 = scmp.lt.s32.totalorder %s1475_s20, %s1475_s20 }
   0xd   :  { %p1482_p6 = por %p1481_p5, %p1480_p4 }
   0xf   :  { %p1483_p7 = pnand %p1482_p6, %p1476_p3 }
  0x11   :  { %1486 = shalt.err (!%p1483_p7)
}
  0x12   :  { %s1561_s21 = smov 64   ;;  %s1562_s22 = smov 4  }
  0x13   :  { %72 = dma.hbm_to_vmem [thread:$0]  %s1818_s5, 1024, %s67_s10, [#allocation10], %s1561_s21, %s1561_s21, %s1562_s22  }
  0x14   :  { %s1487_s27 = scalar_lea.hbm %s1817_s4, 1024 }
  0x15   :  { %p1488_p8 = scmp.ne.s32.totalorder %s1817_s4, %s1487_s27  ;;  %p1491_p9 = scmp.lt.u32.totalorder %s1487_s27, %s1817_s4 }
  0x17   :  { %p1493_p10 = pnand %p1491_p9, %p1488_p8 }
  0x19   :  { %1496 = shalt.err (!%p1493_p10)
}
  0x1a   :  { %s1497_s13 = scalar_lea.vmem %s1617_s12, 1024  ;;  %p1502_p12 = scmp.lt.s32.totalorder %s1617_s12, %s1617_s12 }
  0x1b   :  { %p1498_p11 = scmp.ne.s32.totalorder %s1617_s12, %s1497_s13  ;;  %p1503_p13 = scmp.lt.s32.totalorder %s1497_s13, %s1497_s13 }
  0x1d   :  { %p1504_p0 = por %p1503_p13, %p1502_p12 }
  0x1f   :  { %p1505_p1 = pnand %p1504_p0, %p1498_p11 }
  0x21   :  { %1508 = shalt.err (!%p1505_p1)
}
  0x22   :  { %60 = dma.hbm_to_vmem [thread:$0]  %s1817_s4, 1024, %s1617_s12, [#allocation7], %s1561_s21, %s1561_s21, %s1562_s22  }
  0x23   :  { %s1563_s14 = smov [#allocation11]   ;;  %s1509_s18 = scalar_lea.hbm %s1819_s6, 1024 }
  0x24   :  { %s78_s15 = sshll.u32 %s1563_s14, 4  ;;  %p1510_p2 = scmp.ne.s32.totalorder %s1819_s6, %s1509_s18  ;;  %s79_s15 = int_to_ptr.vmem [resolvable:$true] %s78_s15 }
  0x25   :  { %p1513_p3 = scmp.lt.u32.totalorder %s1509_s18, %s1819_s6 }
  0x27   :  { %p1515_p4 = pnand %p1513_p3, %p1510_p2 }
  0x29   :  { %1518 = shalt.err (!%p1515_p4)
}
  0x2a   :  { %s1519_s25 = scalar_lea.vmem %s79_s15, 1024  ;;  %p1524_p6 = scmp.lt.s32.totalorder %s79_s15, %s79_s15 }
  0x2b   :  { %p1520_p5 = scmp.ne.s32.totalorder %s79_s15, %s1519_s25  ;;  %p1525_p7 = scmp.lt.s32.totalorder %s1519_s25, %s1519_s25 }
  0x2d   :  { %p1526_p8 = por %p1525_p7, %p1524_p6 }
  0x2f   :  { %p1527_p9 = pnand %p1526_p8, %p1520_p5 }
  0x31   :  { %1530 = shalt.err (!%p1527_p9)
}
  0x32   :  { %84 = dma.hbm_to_vmem [thread:$0]  %s1819_s6, 1024, %s79_s15, [#allocation10], %s1561_s21, %s1561_s21, %s1562_s22  }
  0x33   :  { %1553 = dma.done.wait [#allocation7], 1024  }
  0x34   :  { %1554 = vsyncadd [#allocation7], 4294966272 }
  0x35   :  { %1555 = dma.done.wait [#allocation10], 2048  }
  0x36   :  { %1556 = vsyncadd [#allocation10], 4294965248  ;;  %p119_p10 = scmp.lt.s32.totalorder %s1813_s0, 0  ;;  %s1115_s30 = sshll.u32 %s1813_s0, 4  ;;  %v1564_v0 = vmov 0.0  }
  0x37   :  { %p1675_p11 = scmp.lt.s32.totalorder %s1115_s30, 15  ;;  %146 = vst [vmem:[#allocation2] sm:$0xff] %v1564_v0  ;;  %147 = vst [vmem:[#allocation2 + $0x8] sm:$0xff] %v1564_v0  ;;  %p1118_p12 = scmp.le.s32.totalorder %s1814_s1, 0 }
  0x38   :  { %148 = vst [vmem:[#allocation2 + $0x10] sm:$0xff] %v1564_v0  ;;  %149 = vst [vmem:[#allocation2 + $0x18] sm:$0xff] %v1564_v0  ;;  %s1825_s0 = smov (!%p119_p10, %s1813_s0), 0 }
  0x39   :  { %150 = vst [vmem:[#allocation2 + $0x20] sm:$0xff] %v1564_v0  ;;  %151 = vst [vmem:[#allocation2 + $0x28] sm:$0xff] %v1564_v0  ;;  %s1827_s30 = smov (!%p1675_p11, %s1115_s30), 15  ;;  %s1114_s14 = sshll.u32 %s1825_s0, 2 }
  0x3a   :  { %152 = vst [vmem:[#allocation2 + $0x30] sm:$0xff] %v1564_v0  ;;  %153 = vst [vmem:[#allocation2 + $0x38] sm:$0xff] %v1564_v0  ;;  %s1691_s17 = scalar_lea.vmem %s1815_s2, %s1114_s14  ;;  %s1116_s18 = sshll.u32 %s1827_s30, 2 }
  0x3b   :  { %154 = vst [vmem:[#allocation2 + $0x40] sm:$0xff] %v1564_v0  ;;  %155 = vst [vmem:[#allocation2 + $0x48] sm:$0xff] %v1564_v0  ;;  %s1696_s23 = scalar_lea.vmem %s1816_s3, %s1116_s18  ;;  %166 = sbr.rel (%p1118_p12) target bundleno = 319 (0x13f), region = 49  ;;  %v1431_v5 = vld [vmem:[%s1691_s17] sm:$0xff] (!%p1118_p12)   ;;  %v1433_v11 = vld [vmem:[%s1691_s17 + $0x8] sm:$0xff] (!%p1118_p12)  }
  0x3c   :  { %156 = vst [vmem:[#allocation2 + $0x50] sm:$0xff] %v1564_v0  ;;  %157 = vst [vmem:[#allocation2 + $0x58] sm:$0xff] %v1564_v0  ;;  %v1423_v1 = vld [vmem:[%s1696_s23] sm:$0xff] (!%p1118_p12)   ;;  %v1424_v2 = vld [vmem:[%s1696_s23 + $0x8] sm:$0xff] (!%p1118_p12)   ;;  %1303 = vmatprep.mubr.bf16.mxu0 (!%p1118_p12), %v1431_v5 }
  0x3d   :  { %158 = vst [vmem:[#allocation2 + $0x60] sm:$0xff] %v1564_v0  ;;  %159 = vst [vmem:[#allocation2 + $0x68] sm:$0xff] %v1564_v0  ;;  %1287 = vmatprep.subr.bf16.mxu0 (!%p1118_p12), %v1423_v1  ;;  %1383 = vmatprep.subr.bf16.mxu1 (!%p1118_p12), %v1423_v1  ;;  %v1425_v3 = vld [vmem:[%s1696_s23 + $0x10] sm:$0xff] (!%p1118_p12)   ;;  %v1426_v4 = vld [vmem:[%s1696_s23 + $0x18] sm:$0xff] (!%p1118_p12)  }
  0x3e   :  { %160 = vst [vmem:[#allocation2 + $0x70] sm:$0xff] %v1564_v0  ;;  %161 = vst [vmem:[#allocation2 + $0x78] sm:$0xff] %v1564_v0  ;;  %1288 = vmatpush3.bf16.msra.mxu0 (!%p1118_p12), %v1423_v1  ;;  %1391 = vmatpush3.bf16.msra.mxu1 (!%p1118_p12), %v1423_v1  ;;  %v1432_v6 = vld [vmem:[%s1691_s17 + $0x20] sm:$0xff] (!%p1118_p12)   ;;  %v1428_v8 = vld [vmem:[%s1696_s23 + $0x28] sm:$0xff] (!%p1118_p12)  }
  0x3f   :  { %1289 = vmatprep.subr.bf16.mxu0 (!%p1118_p12), %v1424_v2  ;;  %1384 = vmatprep.subr.bf16.mxu1 (!%p1118_p12), %v1424_v2  ;;  %v1427_v7 = vld [vmem:[%s1696_s23 + $0x20] sm:$0xff] (!%p1118_p12)   ;;  %v1429_v9 = vld [vmem:[%s1696_s23 + $0x30] sm:$0xff] (!%p1118_p12)   ;;  %v1430_v10 = vld [vmem:[%s1696_s23 + $0x38] sm:$0xff] (!%p1118_p12)  }
  0x40   :  { %1311 = vmatprep.mubr.bf16.mxu1 (!%p1118_p12), %v1432_v6  ;;  %v1434_v12 = vld [vmem:[%s1691_s17 + $0x28] sm:$0xff] (!%p1118_p12)   ;;  %v1435_v13 = vld [vmem:[%s1691_s17 + $0x10] sm:$0xff] (!%p1118_p12)   ;;  %v1437_v15 = vld [vmem:[%s1691_s17 + $0x18] sm:$0xff] (!%p1118_p12)  }
  0x41   :  { %v1436_v14 = vld [vmem:[%s1691_s17 + $0x30] sm:$0xff] (!%p1118_p12)   ;;  %v1438_v16 = vld [vmem:[%s1691_s17 + $0x38] sm:$0xff] (!%p1118_p12)   ;;  %v167_v19 = vld [vmem:[#allocation2] sm:$0xff] (!%p1118_p12) }
  0x42   :  { %1290 = vmatpush3.bf16.msra.mxu0 %v1424_v2  ;;  %1392 = vmatpush3.bf16.msra.mxu1 %v1424_v2  ;;  %v169_v17 = vld [vmem:[#allocation2 + $0x10] sm:$0xff]  ;;  %v175_v20 = vld [vmem:[#allocation2 + $0x40] sm:$0xff]  ;;  %v170_v23 = vld [vmem:[#allocation2 + $0x18] sm:$0xff] }
  0x43   :  { %1291 = vmatprep.subr.bf16.mxu0 %v1425_v3  ;;  %1385 = vmatprep.subr.bf16.mxu1 %v1425_v3  ;;  %v177_v18 = vld [vmem:[#allocation2 + $0x50] sm:$0xff]  ;;  %v178_v24 = vld [vmem:[#allocation2 + $0x58] sm:$0xff]  ;;  %v168_v29 = vld [vmem:[#allocation2 + $0x8] sm:$0xff] }
  0x44   :  { %v176_v30 = vld [vmem:[#allocation2 + $0x48] sm:$0xff]  ;;  %v173_v41 = vld [vmem:[#allocation2 + $0x30] sm:$0xff]  ;;  %v171_v43 = vld [vmem:[#allocation2 + $0x20] sm:$0xff] }
  0x45   :  { %v181_v42 = vld [vmem:[#allocation2 + $0x70] sm:$0xff]  ;;  %v179_v44 = vld [vmem:[#allocation2 + $0x60] sm:$0xff]  ;;  %v174_v47 = vld [vmem:[#allocation2 + $0x38] sm:$0xff] }
  0x46   :  { %1292 = vmatpush3.bf16.msra.mxu0 %v1425_v3  ;;  %1393 = vmatpush3.bf16.msra.mxu1 %v1425_v3  ;;  %v182_v48 = vld [vmem:[#allocation2 + $0x78] sm:$0xff]  ;;  %v172_v53 = vld [vmem:[#allocation2 + $0x28] sm:$0xff] }
  0x47   :  { %1293 = vmatprep.subr.bf16.mxu0 %v1426_v4  ;;  %1386 = vmatprep.subr.bf16.mxu1 %v1426_v4  ;;  %v180_v54 = vld [vmem:[#allocation2 + $0x68] sm:$0xff] }
  0x4a   :  { %1294 = vmatpush3.bf16.msra.mxu0 %v1426_v4  ;;  %1394 = vmatpush3.bf16.msra.mxu1 %v1426_v4 }
  0x4b   :  { %1295 = vmatprep.subr.bf16.mxu0 %v1427_v7  ;;  %1387 = vmatprep.subr.bf16.mxu1 %v1427_v7 }
  0x4e   :  { %1296 = vmatpush3.bf16.msra.mxu0 %v1427_v7  ;;  %1395 = vmatpush3.bf16.msra.mxu1 %v1427_v7 }
  0x4f   :  { %1297 = vmatprep.subr.bf16.mxu0 %v1428_v8  ;;  %1388 = vmatprep.subr.bf16.mxu1 %v1428_v8 }
  0x52   :  { %1298 = vmatpush3.bf16.msra.mxu0 %v1428_v8  ;;  %1396 = vmatpush3.bf16.msra.mxu1 %v1428_v8 }
  0x53   :  { %1299 = vmatprep.subr.bf16.mxu0 %v1429_v9  ;;  %1389 = vmatprep.subr.bf16.mxu1 %v1429_v9 }
  0x56   :  { %1300 = vmatpush3.bf16.msra.mxu0 %v1429_v9  ;;  %1397 = vmatpush3.bf16.msra.mxu1 %v1429_v9 }
  0x57   :  { %1301 = vmatprep.subr.bf16.mxu0 %v1430_v10  ;;  %1390 = vmatprep.subr.bf16.mxu1 %v1430_v10 }
  0x5a   :  { %1302 = vmatpush3.bf16.msra.mxu0 %v1430_v10  ;;  %1398 = vmatpush3.bf16.msra.mxu1 %v1430_v10 }
  0x5d   :  { %1304 = vmatmul.mubr.bf16.vlgmr.msra.gmra.mrb[0].mxu0 %v1433_v11  ;;  %1312 = vmatmul.mubr.bf16.vlgmr.msra.gmra.mrb[0].mxu1 %v1434_v12 }
  0x5e   :  { %1307 = vmatprep.mubr.bf16.mxu0 %v1435_v13  ;;  %1315 = vmatprep.mubr.bf16.mxu1 %v1436_v14 }
  0x65   :  { %1308 = vmatmul.mubr.bf16.gmra.mrb[4].mxu0 %v1437_v15  ;;  %1316 = vmatmul.mubr.bf16.gmra.mrb[4].mxu1 %v1438_v16 }
 0x130   :  { %v1305_v21 = vpop.f32.mrb[0].mxu0  ;;  %v1313_v22 = vpop.f32.mrb[0].mxu1 }
 0x131   :  { %v410_v25 = vadd.f32 %v1305_v21, %v169_v17  ;;  %v418_v26 = vadd.f32 %v1313_v22, %v177_v18  ;;  %v345_v27 = vpop.f32.mrb[1].mxu0  ;;  %v377_v28 = vpop.f32.mrb[1].mxu1 }
 0x132   :  { %v408_v31 = vadd.f32 %v345_v27, %v167_v19  ;;  %v416_v32 = vadd.f32 %v377_v28, %v175_v20  ;;  %v1306_v33 = vpop.f32.mrb[2].mxu0  ;;  %v1314_v34 = vpop.f32.mrb[2].mxu1 }
 0x133   :  { %426 = vst [vmem:[#allocation2 + $0x10] sm:$0xff] %v410_v25  ;;  %434 = vst [vmem:[#allocation2 + $0x50] sm:$0xff] %v418_v26  ;;  %v411_v35 = vadd.f32 %v1306_v33, %v170_v23  ;;  %v419_v36 = vadd.f32 %v1314_v34, %v178_v24  ;;  %v348_v37 = vpop.f32.mrb[3].mxu0  ;;  %v380_v38 = vpop.f32.mrb[3].mxu1 }
 0x134   :  { %424 = vst [vmem:[#allocation2] sm:$0xff] %v408_v31  ;;  %432 = vst [vmem:[#allocation2 + $0x40] sm:$0xff] %v416_v32  ;;  %v409_v39 = vadd.f32 %v348_v37, %v168_v29  ;;  %v417_v40 = vadd.f32 %v380_v38, %v176_v30 }
 0x135   :  { %427 = vst [vmem:[#allocation2 + $0x18] sm:$0xff] %v411_v35  ;;  %435 = vst [vmem:[#allocation2 + $0x58] sm:$0xff] %v419_v36 }
 0x136   :  { %425 = vst [vmem:[#allocation2 + $0x8] sm:$0xff] %v409_v39  ;;  %433 = vst [vmem:[#allocation2 + $0x48] sm:$0xff] %v417_v40 }
 0x138   :  { %v1309_v45 = vpop.f32.mrb[4].mxu0  ;;  %v1317_v46 = vpop.f32.mrb[4].mxu1 }
 0x139   :  { %v414_v49 = vadd.f32 %v1309_v45, %v173_v41  ;;  %v422_v50 = vadd.f32 %v1317_v46, %v181_v42  ;;  %v361_v51 = vpop.f32.mrb[5].mxu0  ;;  %v393_v52 = vpop.f32.mrb[5].mxu1 }
 0x13a   :  { %v412_v55 = vadd.f32 %v361_v51, %v171_v43  ;;  %v420_v56 = vadd.f32 %v393_v52, %v179_v44  ;;  %v1310_v57 = vpop.f32.mrb[6].mxu0  ;;  %v1318_v58 = vpop.f32.mrb[6].mxu1 }
 0x13b   :  { %430 = vst [vmem:[#allocation2 + $0x30] sm:$0xff] %v414_v49  ;;  %438 = vst [vmem:[#allocation2 + $0x70] sm:$0xff] %v422_v50  ;;  %v415_v59 = vadd.f32 %v1310_v57, %v174_v47  ;;  %v423_v60 = vadd.f32 %v1318_v58, %v182_v48  ;;  %v364_v61 = vpop.f32.mrb[7].mxu0  ;;  %v396_v62 = vpop.f32.mrb[7].mxu1 }
 0x13c   :  { %428 = vst [vmem:[#allocation2 + $0x20] sm:$0xff] %v412_v55  ;;  %436 = vst [vmem:[#allocation2 + $0x60] sm:$0xff] %v420_v56  ;;  %v413_v63 = vadd.f32 %v364_v61, %v172_v53  ;;  %v421_v0 = vadd.f32 %v396_v62, %v180_v54 }
 0x13d   :  { %431 = vst [vmem:[#allocation2 + $0x38] sm:$0xff] %v415_v59  ;;  %439 = vst [vmem:[#allocation2 + $0x78] sm:$0xff] %v423_v60 }
 0x13e   :  { %429 = vst [vmem:[#allocation2 + $0x28] sm:$0xff] %v413_v63  ;;  %437 = vst [vmem:[#allocation2 + $0x68] sm:$0xff] %v421_v0 }
 0x13f PF:  { %v461_v1 = vld [vmem:[%s1821_s8 + $0x10] sm:$0xff]  ;;  %v459_v2 = vld [vmem:[%s1821_s8] sm:$0xff]  ;;  %v1565_v3 = vmov 0   ;;  %v462_v4 = vld [vmem:[%s1821_s8 + $0x18] sm:$0xff] }
 0x140   :  { %1440 = vset.pattern.permute.xlu1 %v1565_v3  ;;  %1439 = vset.pattern.permute.xlu0 %v1565_v3  ;;  %v460_v5 = vld [vmem:[%s1821_s8 + $0x8] sm:$0xff]  ;;  %v463_v7 = vld [vmem:[%s1821_s8 + $0x20] sm:$0xff]  ;;  %v466_v11 = vld [vmem:[%s1821_s8 + $0x38] sm:$0xff] }
 0x141   :  { %487 = vperm.xlu1 %1440, %v461_v1   ;;  %477 = vperm.xlu0 %1439, %v459_v2   ;;  %v464_v6 = vld [vmem:[%s1821_s8 + $0x28] sm:$0xff]  ;;  %v1441_v8 = vld [vmem:[#allocation11] sm:$0xff]   ;;  %v465_v13 = vld [vmem:[%s1821_s8 + $0x30] sm:$0xff] }
 0x142   :  { %v1442_v9 = vld [vmem:[#allocation9] sm:$0xff]   ;;  %1319 = vmatprep.subr.bf16.mxu1 %v1441_v8  ;;  %v1443_v10 = vld [vmem:[#allocation11 + $0x8] sm:$0xff]   ;;  %v1445_v14 = vld [vmem:[#allocation11 + $0x10] sm:$0xff]  }
 0x143   :  { %1320 = vmatpush3.bf16.msra.mxu1 %v1441_v8  ;;  %1351 = vmatprep.subr.bf16.mxu0 %v1442_v9  ;;  %v1444_v12 = vld [vmem:[#allocation9 + $0x8] sm:$0xff]   ;;  %v1446_v15 = vld [vmem:[#allocation9 + $0x10] sm:$0xff]   ;;  %v467_v17 = vld [vmem:[%s1821_s8 + $0x40] sm:$0xff] }
 0x144   :  { %1321 = vmatprep.subr.bf16.mxu1 %v1443_v10  ;;  %1352 = vmatpush3.bf16.msra.mxu0 %v1442_v9  ;;  %v468_v16 = vld [vmem:[%s1821_s8 + $0x48] sm:$0xff]  ;;  %v1447_v18 = vld [vmem:[#allocation11 + $0x18] sm:$0xff]   ;;  %v469_v21 = vld [vmem:[%s1821_s8 + $0x50] sm:$0xff] }
 0x145   :  { %492 = vperm.xlu1 %1440, %v462_v4   ;;  %482 = vperm.xlu0 %1439, %v460_v5   ;;  %v1448_v19 = vld [vmem:[#allocation9 + $0x18] sm:$0xff]   ;;  %v1449_v22 = vld [vmem:[#allocation11 + $0x20] sm:$0xff]   ;;  %v472_v24 = vld [vmem:[%s1821_s8 + $0x68] sm:$0xff] }
 0x146   :  { %1353 = vmatprep.subr.bf16.mxu0 %v1444_v12  ;;  %v470_v20 = vld [vmem:[%s1821_s8 + $0x58] sm:$0xff]  ;;  %v1450_v23 = vld [vmem:[#allocation9 + $0x20] sm:$0xff]   ;;  %v1451_v27 = vld [vmem:[#allocation11 + $0x28] sm:$0xff]  }
 0x147   :  { %1322 = vmatpush3.bf16.msra.mxu1 %v1443_v10  ;;  %v471_v25 = vld [vmem:[%s1821_s8 + $0x60] sm:$0xff]  ;;  %v1452_v28 = vld [vmem:[#allocation9 + $0x28] sm:$0xff]   ;;  %v474_v29 = vld [vmem:[%s1821_s8 + $0x78] sm:$0xff] }
 0x148   :  { %1323 = vmatprep.subr.bf16.mxu1 %v1445_v14  ;;  %1354 = vmatpush3.bf16.msra.mxu0 %v1444_v12  ;;  %v1456_v26 = vld [vmem:[#allocation6] sm:$0xff]   ;;  %v473_v30 = vld [vmem:[%s1821_s8 + $0x70] sm:$0xff]  ;;  %v1455_v33 = vld [vmem:[#allocation11 + $0x38] sm:$0xff]  }
 0x149   :  { %502 = vperm.xlu1 %1440, %v464_v6   ;;  %497 = vperm.xlu0 %1439, %v463_v7   ;;  %v1453_v31 = vld [vmem:[#allocation11 + $0x30] sm:$0xff]   ;;  %v1457_v34 = vld [vmem:[#allocation9 + $0x38] sm:$0xff]   ;;  %v1458_v35 = vld [vmem:[#allocation6 + $0x8] sm:$0xff]  }
 0x14a   :  { %1355 = vmatprep.subr.bf16.mxu0 %v1446_v15  ;;  %1335 = vmatprep.mubr.bf16.mxu1 %v1456_v26  ;;  %v1454_v32 = vld [vmem:[#allocation9 + $0x30] sm:$0xff]   ;;  %v1460_v37 = vld [vmem:[#allocation6 + $0x18] sm:$0xff]   ;;  %v1461_v38 = vld [vmem:[#allocation6 + $0x20] sm:$0xff]  }
 0x14b   :  { %1324 = vmatpush3.bf16.msra.mxu1 %v1445_v14  ;;  %v1459_v36 = vld [vmem:[#allocation6 + $0x10] sm:$0xff]   ;;  %v1462_v39 = vld [vmem:[#allocation6 + $0x28] sm:$0xff]   ;;  %v1464_v41 = vld [vmem:[#allocation6 + $0x38] sm:$0xff]  }
 0x14c   :  { %1325 = vmatprep.subr.bf16.mxu1 %v1447_v18  ;;  %1356 = vmatpush3.bf16.msra.mxu0 %v1446_v15  ;;  %v1463_v40 = vld [vmem:[#allocation6 + $0x30] sm:$0xff]   ;;  %v443_v45 = vld [vmem:[#allocation2] sm:$0xff]  ;;  %v446_v46 = vld [vmem:[#allocation2 + $0x18] sm:$0xff] }
 0x14d   :  { %512 = vperm.xlu1 %1440, %v466_v11   ;;  %507 = vperm.xlu0 %1439, %v465_v13   ;;  %v445_v44 = vld [vmem:[#allocation2 + $0x10] sm:$0xff]  ;;  %v444_v47 = vld [vmem:[#allocation2 + $0x8] sm:$0xff]  ;;  %v447_v55 = vld [vmem:[#allocation2 + $0x20] sm:$0xff] }
 0x14e   :  { %1357 = vmatprep.subr.bf16.mxu0 %v1448_v19  ;;  %v448_v54 = vld [vmem:[#allocation2 + $0x28] sm:$0xff]  ;;  %v450_v62 = vld [vmem:[#allocation2 + $0x38] sm:$0xff]  ;;  %v449_v63 = vld [vmem:[#allocation2 + $0x30] sm:$0xff] }
 0x14f   :  { %1326 = vmatpush3.bf16.msra.mxu1 %v1447_v18  ;;  %v452_v5 = vld [vmem:[#allocation2 + $0x48] sm:$0xff]  ;;  %v451_v6 = vld [vmem:[#allocation2 + $0x40] sm:$0xff]  ;;  %v454_v12 = vld [vmem:[#allocation2 + $0x58] sm:$0xff] }
 0x150   :  { %1327 = vmatprep.subr.bf16.mxu1 %v1449_v22  ;;  %1358 = vmatpush3.bf16.msra.mxu0 %v1448_v19  ;;  %v453_v13 = vld [vmem:[#allocation2 + $0x50] sm:$0xff]  ;;  %v456_v19 = vld [vmem:[#allocation2 + $0x68] sm:$0xff]  ;;  %v458_v26 = vld [vmem:[#allocation2 + $0x78] sm:$0xff] }
 0x151   :  { %522 = vperm.xlu1 %1440, %v468_v16   ;;  %517 = vperm.xlu0 %1439, %v467_v17  }
 0x152   :  { %1359 = vmatprep.subr.bf16.mxu0 %v1450_v23 }
 0x153   :  { %1328 = vmatpush3.bf16.msra.mxu1 %v1449_v22 }
 0x154   :  { %1329 = vmatprep.subr.bf16.mxu1 %v1451_v27  ;;  %1360 = vmatpush3.bf16.msra.mxu0 %v1450_v23 }
 0x155   :  { %532 = vperm.xlu1 %1440, %v470_v20   ;;  %527 = vperm.xlu0 %1439, %v469_v21   ;;  %v455_v20 = vld [vmem:[#allocation2 + $0x60] sm:$0xff] }
 0x156   :  { %1361 = vmatprep.subr.bf16.mxu0 %v1452_v28 }
 0x157   :  { %1330 = vmatpush3.bf16.msra.mxu1 %v1451_v27  ;;  %v457_v27 = vld [vmem:[#allocation2 + $0x70] sm:$0xff] }
 0x158   :  { %1331 = vmatprep.subr.bf16.mxu1 %v1453_v31  ;;  %1362 = vmatpush3.bf16.msra.mxu0 %v1452_v28 }
 0x159   :  { %542 = vperm.xlu1 %1440, %v472_v24   ;;  %537 = vperm.xlu0 %1439, %v471_v25  }
 0x15a   :  { %1363 = vmatprep.subr.bf16.mxu0 %v1454_v32 }
 0x15b   :  { %1332 = vmatpush3.bf16.msra.mxu1 %v1453_v31 }
 0x15c   :  { %1333 = vmatprep.subr.bf16.mxu1 %v1455_v33  ;;  %1364 = vmatpush3.bf16.msra.mxu0 %v1454_v32 }
 0x15d   :  { %552 = vperm.xlu1 %1440, %v474_v29   ;;  %547 = vperm.xlu0 %1439, %v473_v30  }
 0x15e   :  { %1365 = vmatprep.subr.bf16.mxu0 %v1457_v34 }
 0x15f   :  { %1334 = vmatpush3.bf16.msra.mxu1 %v1455_v33 }
 0x160   :  { %1366 = vmatpush3.bf16.msra.mxu0 %v1457_v34 }
 0x162   :  { %1336 = vmatmul.mubr.bf16.vlgmr.msra.gmra.mrb[0].mxu1 %v1458_v35 }
 0x163   :  { %1339 = vmatprep.mubr.bf16.mxu1 %v1459_v36 }
 0x16a   :  { %1340 = vmatmul.mubr.bf16.gmra.mrb[4].mxu1 %v1460_v37 }
 0x16b   :  { %1343 = vmatprep.mubr.bf16.mxu1 %v1461_v38 }
 0x172   :  { %1344 = vmatmul.mubr.bf16.gmra.mrb[8].mxu1 %v1462_v39 }
 0x173   :  { %1347 = vmatprep.mubr.bf16.mxu1 %v1463_v40 }
 0x17a   :  { %1348 = vmatmul.mubr.bf16.gmra.mrb[12].mxu1 %v1464_v41 }
 0x1c0   :  { %v488_v42 = vpop.permute.xlu1 %487  ;;  %v478_v43 = vpop.permute.xlu0 %477 }
 0x1c1   :  { %v557_v50 = vmul.f32 %v488_v42, %v445_v44  ;;  %v555_v51 = vmul.f32 %v478_v43, %v443_v45 }
 0x1c4   :  { %v493_v48 = vpop.permute.xlu1 %492  ;;  %v483_v49 = vpop.permute.xlu0 %482 }
 0x1c5   :  { %v558_v52 = vmul.f32 %v493_v48, %v446_v46  ;;  %v556_v53 = vmul.f32 %v483_v49, %v444_v47 }
 0x1c7   :  { %v572_v56 = vpack.c.bf16 %v558_v52, %v557_v50  ;;  %v571_v57 = vpack.c.bf16 %v556_v53, %v555_v51  ;;  %v1776_v51 = vld [vmem:[%s1820_s7] ss:$0 sm:$0xff]  ;;  %s1566_s7 = smov [#allocation12]  }
 0x1c8   :  { %v503_v58 = vpop.permute.xlu1 %502  ;;  %v498_v59 = vpop.permute.xlu0 %497  ;;  %s1089_s27 = sshll.u32 %s1566_s7, 4  ;;  %s1090_s27 = int_to_ptr.vmem [resolvable:$true] %s1089_s27 }
 0x1c9   :  { %v560_v60 = vmul.f32 %v503_v58, %v448_v54  ;;  %v559_v61 = vmul.f32 %v498_v59, %v447_v55  ;;  %1367 = vmatprep.mubr.bf16.mxu0 %v571_v57  ;;  %s1531_s28 = scalar_lea.vmem %s1090_s27, 1024  ;;  %p1536_p0 = scmp.lt.s32.totalorder %s1090_s27, %s1090_s27 }
 0x1ca   :  { %1368 = vmatmul.mubr.bf16.vlgmr.msra.gmra.mrb[0].mxu0 %v572_v56  ;;  %p1532_p13 = scmp.ne.s32.totalorder %s1090_s27, %s1531_s28  ;;  %p1537_p1 = scmp.lt.s32.totalorder %s1531_s28, %s1531_s28 }
 0x1cb   :  { %v573_v0 = vpack.c.bf16 %v560_v60, %v559_v61 }
 0x1cc   :  { %v513_v1 = vpop.permute.xlu1 %512  ;;  %v508_v2 = vpop.permute.xlu0 %507  ;;  %p1538_p2 = por %p1537_p1, %p1536_p0 }
 0x1cd   :  { %v562_v3 = vmul.f32 %v513_v1, %v450_v62  ;;  %v561_v4 = vmul.f32 %v508_v2, %v449_v63  ;;  %1371 = vmatprep.mubr.bf16.mxu0 %v573_v0 }
 0x1ce   :  { %p1539_p3 = pnand %p1538_p2, %p1532_p13 }
 0x1cf   :  { %v574_v7 = vpack.c.bf16 %v562_v3, %v561_v4 }
 0x1d0   :  { %v523_v8 = vpop.permute.xlu1 %522  ;;  %v518_v9 = vpop.permute.xlu0 %517 }
 0x1d1   :  { %v564_v10 = vmul.f32 %v523_v8, %v452_v5  ;;  %v563_v11 = vmul.f32 %v518_v9, %v451_v6 }
 0x1d2   :  { %1372 = vmatmul.mubr.bf16.gmra.mrb[4].mxu0 %v574_v7 }
 0x1d3   :  { %v575_v14 = vpack.c.bf16 %v564_v10, %v563_v11 }
 0x1d4   :  { %v533_v15 = vpop.permute.xlu1 %532  ;;  %v528_v16 = vpop.permute.xlu0 %527 }
 0x1d5   :  { %v566_v17 = vmul.f32 %v533_v15, %v454_v12  ;;  %v565_v18 = vmul.f32 %v528_v16, %v453_v13  ;;  %1375 = vmatprep.mubr.bf16.mxu0 %v575_v14 }
 0x1d7   :  { %v576_v21 = vpack.c.bf16 %v566_v17, %v565_v18 }
 0x1d8   :  { %v543_v22 = vpop.permute.xlu1 %542  ;;  %v538_v23 = vpop.permute.xlu0 %537 }
 0x1d9   :  { %v568_v24 = vmul.f32 %v543_v22, %v456_v19  ;;  %v567_v25 = vmul.f32 %v538_v23, %v455_v20 }
 0x1da   :  { %1376 = vmatmul.mubr.bf16.gmra.mrb[8].mxu0 %v576_v21 }
 0x1db   :  { %v577_v28 = vpack.c.bf16 %v568_v24, %v567_v25 }
 0x1dc   :  { %v553_v29 = vpop.permute.xlu1 %552  ;;  %v548_v30 = vpop.permute.xlu0 %547 }
 0x1dd   :  { %v570_v31 = vmul.f32 %v553_v29, %v458_v26  ;;  %v569_v32 = vmul.f32 %v548_v30, %v457_v27  ;;  %1379 = vmatprep.mubr.bf16.mxu0 %v577_v28 }
 0x1df   :  { %v578_v33 = vpack.c.bf16 %v570_v31, %v569_v32 }
 0x1e2   :  { %1380 = vmatmul.mubr.bf16.gmra.mrb[12].mxu0 %v578_v33 }
 0x235   :  { %v1337_v34 = vpop.f32.mrb[0].mxu1 }
 0x236   :  { %v757_v35 = vpop.f32.mrb[1].mxu1 }
 0x237   :  { %v1338_v36 = vpop.f32.mrb[2].mxu1 }
 0x238   :  { %v760_v37 = vpop.f32.mrb[3].mxu1 }
 0x23d   :  { %v1341_v38 = vpop.f32.mrb[4].mxu1 }
 0x23e   :  { %v773_v39 = vpop.f32.mrb[5].mxu1 }
 0x23f   :  { %v1342_v40 = vpop.f32.mrb[6].mxu1 }
 0x240   :  { %v776_v41 = vpop.f32.mrb[7].mxu1 }
 0x245   :  { %v1345_v42 = vpop.f32.mrb[8].mxu1 }
 0x246   :  { %v789_v43 = vpop.f32.mrb[9].mxu1 }
 0x247   :  { %v1346_v44 = vpop.f32.mrb[10].mxu1 }
 0x248   :  { %v792_v45 = vpop.f32.mrb[11].mxu1 }
 0x24d   :  { %v1765_v46 = vpop.f32.mrb[12].mxu1 }
 0x24e   :  { %v1767_v47 = vpop.f32.mrb[13].mxu1 }
 0x24f   :  { %v1769_v48 = vpop.f32.mrb[14].mxu1 }
 0x250   :  { %v1771_v49 = vpop.f32.mrb[15].mxu1 }
 0x29d   :  { %v1369_v50 = vpop.f32.mrb[0].mxu0 }
 0x29e   :  { %v911_v52 = vadd.f32 %v1369_v50, %v1337_v34  ;;  %v902_v53 = vpop.f32.mrb[1].mxu0 }
 0x29f   :  { %v903_v54 = vadd.f32 %v902_v53, %v757_v35  ;;  %v1370_v55 = vpop.f32.mrb[2].mxu0 }
 0x2a0   :  { %v974_v56 = vadd.f32 %v1776_v51, %v911_v52  ;;  %v914_v57 = vadd.f32 %v1370_v55, %v1338_v36  ;;  %v905_v58 = vpop.f32.mrb[3].mxu0 }
 0x2a1   :  { %v972_v59 = vadd.f32 %v1776_v51, %v903_v54  ;;  %v906_v60 = vadd.f32 %v905_v58, %v760_v37 }
 0x2a2   :  { %v975_v61 = vadd.f32 %v1776_v51, %v914_v57  ;;  %v990_v63 = vmax.f32 %v974_v56, 0.0 }
 0x2a3   :  { %v973_v62 = vadd.f32 %v1776_v51, %v906_v60  ;;  %v988_v1 = vmax.f32 %v972_v59, 0.0 }
 0x2a4   :  { %v991_v0 = vmax.f32 %v975_v61, 0.0 }
 0x2a5   :  { %v989_v2 = vmax.f32 %v973_v62, 0.0  ;;  %v1373_v3 = vpop.f32.mrb[4].mxu0 }
 0x2a6   :  { %v1200_v4 = vpack.c.bf16 %v991_v0, %v990_v63  ;;  %v927_v5 = vadd.f32 %v1373_v3, %v1341_v38  ;;  %v918_v6 = vpop.f32.mrb[5].mxu0 }
 0x2a7   :  { %v1195_v7 = vpack.c.bf16 %v989_v2, %v988_v1  ;;  %v919_v8 = vadd.f32 %v918_v6, %v773_v39  ;;  %v1374_v9 = vpop.f32.mrb[6].mxu0 }
 0x2a8   :  { %1232 = vst [vmem:[#allocation12 + $0x8] sm:$0xff] %v1200_v4   ;;  %v978_v10 = vadd.f32 %v1776_v51, %v927_v5  ;;  %v930_v11 = vadd.f32 %v1374_v9, %v1342_v40  ;;  %v921_v12 = vpop.f32.mrb[7].mxu0 }
 0x2a9   :  { %1196 = vst [vmem:[#allocation12] sm:$0xff] %v1195_v7   ;;  %v976_v13 = vadd.f32 %v1776_v51, %v919_v8  ;;  %v922_v14 = vadd.f32 %v921_v12, %v776_v41 }
 0x2aa   :  { %v979_v15 = vadd.f32 %v1776_v51, %v930_v11  ;;  %v994_v17 = vmax.f32 %v978_v10, 0.0 }
 0x2ab   :  { %v977_v16 = vadd.f32 %v1776_v51, %v922_v14  ;;  %v992_v19 = vmax.f32 %v976_v13, 0.0 }
 0x2ac   :  { %v995_v18 = vmax.f32 %v979_v15, 0.0 }
 0x2ad   :  { %v993_v20 = vmax.f32 %v977_v16, 0.0  ;;  %v1377_v21 = vpop.f32.mrb[8].mxu0 }
 0x2ae   :  { %v1210_v22 = vpack.c.bf16 %v995_v18, %v994_v17  ;;  %v943_v23 = vadd.f32 %v1377_v21, %v1345_v42  ;;  %v934_v24 = vpop.f32.mrb[9].mxu0 }
 0x2af   :  { %v1205_v25 = vpack.c.bf16 %v993_v20, %v992_v19  ;;  %v935_v26 = vadd.f32 %v934_v24, %v789_v43  ;;  %v1378_v27 = vpop.f32.mrb[10].mxu0 }
 0x2b0   :  { %1234 = vst [vmem:[#allocation12 + $0x18] sm:$0xff] %v1210_v22   ;;  %v982_v28 = vadd.f32 %v1776_v51, %v943_v23  ;;  %v946_v29 = vadd.f32 %v1378_v27, %v1346_v44  ;;  %v937_v30 = vpop.f32.mrb[11].mxu0 }
 0x2b1   :  { %1233 = vst [vmem:[#allocation12 + $0x10] sm:$0xff] %v1205_v25   ;;  %v980_v31 = vadd.f32 %v1776_v51, %v935_v26  ;;  %v938_v32 = vadd.f32 %v937_v30, %v792_v45 }
 0x2b2   :  { %v983_v33 = vadd.f32 %v1776_v51, %v946_v29  ;;  %v998_v35 = vmax.f32 %v982_v28, 0.0 }
 0x2b3   :  { %v981_v34 = vadd.f32 %v1776_v51, %v938_v32  ;;  %v996_v37 = vmax.f32 %v980_v31, 0.0 }
 0x2b4   :  { %v999_v36 = vmax.f32 %v983_v33, 0.0 }
 0x2b5   :  { %v997_v38 = vmax.f32 %v981_v34, 0.0  ;;  %v1381_v39 = vpop.f32.mrb[12].mxu0 }
 0x2b6   :  { %v1220_v40 = vpack.c.bf16 %v999_v36, %v998_v35  ;;  %v959_v41 = vadd.f32 %v1381_v39, %v1765_v46  ;;  %v950_v42 = vpop.f32.mrb[13].mxu0 }
 0x2b7   :  { %v1215_v43 = vpack.c.bf16 %v997_v38, %v996_v37  ;;  %v951_v44 = vadd.f32 %v950_v42, %v1767_v47  ;;  %v1382_v50 = vpop.f32.mrb[14].mxu0 }
 0x2b8   :  { %1236 = vst [vmem:[#allocation12 + $0x28] sm:$0xff] %v1220_v40   ;;  %v986_v45 = vadd.f32 %v1776_v51, %v959_v41  ;;  %v962_v52 = vadd.f32 %v1382_v50, %v1769_v48  ;;  %v953_v53 = vpop.f32.mrb[15].mxu0 }
 0x2b9   :  { %1235 = vst [vmem:[#allocation12 + $0x20] sm:$0xff] %v1215_v43   ;;  %v984_v54 = vadd.f32 %v1776_v51, %v951_v44  ;;  %v954_v55 = vadd.f32 %v953_v53, %v1771_v49 }
 0x2ba   :  { %v987_v56 = vadd.f32 %v1776_v51, %v962_v52  ;;  %v1002_v57 = vmax.f32 %v986_v45, 0.0 }
 0x2bb   :  { %v985_v46 = vadd.f32 %v1776_v51, %v954_v55  ;;  %v1000_v47 = vmax.f32 %v984_v54, 0.0 }
 0x2bc   :  { %v1003_v58 = vmax.f32 %v987_v56, 0.0 }
 0x2bd   :  { %v1001_v59 = vmax.f32 %v985_v46, 0.0 }
 0x2be   :  { %v1230_v60 = vpack.c.bf16 %v1003_v58, %v1002_v57 }
 0x2bf   :  { %v1225_v61 = vpack.c.bf16 %v1001_v59, %v1000_v47 }
 0x2c0   :  { %1238 = vst [vmem:[#allocation12 + $0x38] sm:$0xff] %v1230_v60  }
 0x2c1   :  { %1237 = vst [vmem:[#allocation12 + $0x30] sm:$0xff] %v1225_v61  }
 0x2c2   :  { %1542 = shalt.err (!%p1539_p3)
}
 0x2c3   :  { %s1543_s11 = scalar_lea.hbm %s1822_s9, 1024 }
 0x2c4   :  { %p1544_p4 = scmp.ne.s32.totalorder %s1822_s9, %s1543_s11  ;;  %p1547_p5 = scmp.lt.u32.totalorder %s1543_s11, %s1822_s9 }
 0x2c6   :  { %p1549_p6 = pnand %p1547_p5, %p1544_p4 }
 0x2c8   :  { %1552 = shalt.err (!%p1549_p6)
}
 0x2c9   :  { %1095 = dma.vmem_to_hbm [thread:$0]  %s1090_s27, 1024, %s1822_s9, [#allocation8], %s1561_s21, %s1561_s21, %s1562_s22  }
 0x2ca   :  { %1557 = dma.done.wait [#allocation8], 1024  }
 0x2cb   :  { %1558 = vsyncadd [#allocation8], 4294966272 }
 0x2cc   :  { %1099 = vsyncpa [#allocation7], 1 }
 0x2cd   :  { %1100 = vsyncpa [#allocation10], 1 }
 0x2ce   :  { %1101 = vsyncpa [#allocation8], 1 }

</bundles_post_ra>
